<compile_context>
chip_gen: v7x
topology: tpu7x:2x2x1
jax: 0.10.0
libtpu: 0.0.40
codegen_flags: <defaults>
</compile_context>

<pallas_src>
import jax
import jax.numpy as jnp
import numpy as np
from jax.experimental import pallas as pl
from jax.experimental.pallas import tpu as pltpu


def population_kernel(p_ref, lat_ref, wp_ref, wl_ref, bp_ref, bl_ref,
                      wf_ref, bf_ref, out_ref, fo_ref):
    od = wp_ref.shape[1]          # output_dim (static)
    cdt = wp_ref.dtype            # bf16 MXU input dtype

    # fc_p / fc_latent: cast activations to bf16 in-kernel (VPU, free),
    # accumulate in f32 on the MXU, add f32 biases.
    p_o = jnp.dot(p_ref[...].astype(cdt), wp_ref[...],
                  preferred_element_type=jnp.float32) + bp_ref[...]
    l_o = jnp.dot(lat_ref[...].astype(cdt), wl_ref[...],
                  preferred_element_type=jnp.float32) + bl_ref[...]

    # f_o = concat([p_o, l_o], dim=1): write the two 128-lane-aligned halves
    # directly — no in-kernel concatenate / relayout, unmasked stores.
    fo_ref[:, :od] = p_o.astype(fo_ref.dtype)
    fo_ref[:, od:] = l_o.astype(fo_ref.dtype)

    # fc_final on the split halves: out = p_o @ Wf[:od] + l_o @ Wf[od:] + bf.
    # Wf/bf are zero-padded to a 128-lane multiple -> lane-dense unmasked store.
    out = (jnp.dot(p_o.astype(cdt), wf_ref[:od, :],
                   preferred_element_type=jnp.float32)
           + jnp.dot(l_o.astype(cdt), wf_ref[od:, :],
                     preferred_element_type=jnp.float32)
           + bf_ref[...])
    out_ref[...] = out.astype(out_ref.dtype)


def prepare_population_params(wp_t, bp, wl_t, bl, wf_t, bf,
                              *, compute_dtype=jnp.bfloat16):
    """One-time weight prep (hoisted out of the per-call hot path).

    wp_t/wl_t/wf_t are pre-transposed (in_features, out_features); biases are
    (1, out_features). Weights are cast to bf16 (MXU-native); Wf/bf are
    zero-padded along out_dim to a 128-lane multiple so the kernel's output
    store is unmasked and padded output columns are exact zeros.
    """
    output_dim = wp_t.shape[1]
    assert wl_t.shape[1] == output_dim
    fo_dim = 2 * output_dim
    # fc_final takes output_dim + hidden_dim inputs; the module is only
    # shape-consistent when hidden_dim == output_dim.
    assert wf_t.shape[0] == fo_dim, "fc_final requires hidden_dim == output_dim"
    out_dim = wf_t.shape[1]
    out_pad = ((out_dim + 127) // 128) * 128

    wf_p = (jnp.zeros((fo_dim, out_pad), jnp.float32)
            .at[:, :out_dim].set(wf_t).astype(compute_dtype))
    bf_p = jnp.zeros((1, out_pad), jnp.float32).at[:, :out_dim].set(bf)

    return dict(
        wp=wp_t.astype(compute_dtype),
        wl=wl_t.astype(compute_dtype),
        bp=bp.astype(jnp.float32),
        bl=bl.astype(jnp.float32),
        wf=wf_p,
        bf=bf_p,
        output_dim=output_dim,
        fo_dim=fo_dim,
        out_dim=out_dim,
        out_pad=out_pad,
    )


def _pick_batch_tile(B, max_tile=1024):
    # Overhead-bound kernel (~1.4 MFLOP/step): fewest, biggest grid steps.
    # Collapse to a single step for small B; for large B keep >= 2 steps so
    # dimension_semantics=("parallel",) can shard the batch axis across v7x's
    # two TensorCores. Tiles are multiples of 8 so every full block is legal;
    # a partial last block relies on Pallas write masking (correct).
    if B <= 512:
        return B
    tb = min(max_tile, -(-B // 2))      # ceil(B/2)
    tb = max(8, (tb // 8) * 8)
    return tb


def population_forward(p, latent, params, *, slice_out=True,
                       fo_dtype=jnp.float32):
    """Forward pass. `params` comes from prepare_population_params (call once).

    Returns (out, f_o). With slice_out=False, `out` is the (B, out_pad) padded
    buffer whose columns >= out_dim are exact zeros (skips one HBM copy).
    """
    B, p_dim = p.shape
    latent_dim = latent.shape[1]
    output_dim = params["output_dim"]
    fo_dim = params["fo_dim"]
    out_dim = params["out_dim"]
    out_pad = params["out_pad"]

    tb = _pick_batch_tile(B)
    grid = (pl.cdiv(B, tb),)

    out_p, f_o = pl.pallas_call(
        population_kernel,
        out_shape=(
            jax.ShapeDtypeStruct((B, out_pad), jnp.float32),
            jax.ShapeDtypeStruct((B, fo_dim), fo_dtype),
        ),
        grid=grid,
        in_specs=[
            pl.BlockSpec((tb, p_dim), lambda i: (i, 0)),               # p (tiled)
            pl.BlockSpec((tb, latent_dim), lambda i: (i, 0)),          # latent (tiled)
            pl.BlockSpec((p_dim, output_dim), lambda i: (0, 0)),       # Wp (resident)
            pl.BlockSpec((latent_dim, output_dim), lambda i: (0, 0)),  # Wl (resident)
            pl.BlockSpec((1, output_dim), lambda i: (0, 0)),           # bp (resident)
            pl.BlockSpec((1, output_dim), lambda i: (0, 0)),           # bl (resident)
            pl.BlockSpec((fo_dim, out_pad), lambda i: (0, 0)),         # Wf padded (resident)
            pl.BlockSpec((1, out_pad), lambda i: (0, 0)),              # bf padded (resident)
        ],
        out_specs=(
            pl.BlockSpec((tb, out_pad), lambda i: (i, 0)),
            pl.BlockSpec((tb, fo_dim), lambda i: (i, 0)),
        ),
        compiler_params=pltpu.CompilerParams(
            dimension_semantics=("parallel",)),
    )(p, latent, params["wp"], params["wl"], params["bp"], params["bl"],
      params["wf"], params["bf"])

    out = out_p[:, :out_dim] if slice_out else out_p
    return out, f_o


if __name__ == "__main__":
    # Small, shape-consistent dims; hidden_dim == output_dim is required by the
    # PyTorch module's own shape algebra. `g` is unused by the forward.
    B = 64
    p_dim = 32
    latent_dim = 16
    hidden_dim = 128
    output_dim = 128
    out_dim = 32

    key = jax.random.PRNGKey(0)
    keys = jax.random.split(key, 8)

    def init_linear(kw, kb, in_dim, o_dim):
        bound = 1.0 / np.sqrt(in_dim)
        w = jax.random.uniform(kw, (in_dim, o_dim), jnp.float32, -bound, bound)
        b = jax.random.uniform(kb, (1, o_dim), jnp.float32, -bound, bound)
        return w, b

    wp_t, bp = init_linear(keys[0], keys[1], p_dim, output_dim)                 # fc_p
    wl_t, bl = init_linear(keys[2], keys[3], latent_dim, output_dim)            # fc_latent
    wf_t, bf = init_linear(keys[4], keys[5], output_dim + hidden_dim, out_dim)  # fc_final

    p = jax.random.normal(keys[6], (B, p_dim), jnp.float32)
    latent = jax.random.normal(keys[7], (B, latent_dim), jnp.float32)

    # One-time prep (hoisted out of the per-call path).
    params = jax.tree_util.tree_map(
        lambda a: jax.block_until_ready(a) if isinstance(a, jax.Array) else a,
        prepare_population_params(wp_t, bp, wl_t, bl, wf_t, bf))

    out, f_o = population_forward(p, latent, params, slice_out=True)
    jax.block_until_ready((out, f_o))

    # Reference mirrors the kernel's bf16 input quantization; matmuls are done
    # in numpy (exact f32 on host) to avoid XLA dot-precision ambiguity.
    def q(a):
        return np.asarray(jnp.asarray(a).astype(jnp.bfloat16).astype(jnp.float32))

    p_q, lat_q = q(p), q(latent)
    wp_q, wl_q, wf_q = q(wp_t), q(wl_t), q(wf_t)
    f_o_ref = np.concatenate([p_q @ wp_q + np.asarray(bp),
                              lat_q @ wl_q + np.asarray(bl)], axis=1)
    out_ref = q(f_o_ref) @ wf_q + np.asarray(bf)

    assert out.shape == (B, out_dim) and f_o.shape == (B, 2 * output_dim)
    assert np.allclose(np.asarray(f_o), f_o_ref, atol=1e-3, rtol=1e-3), \
        float(np.max(np.abs(np.asarray(f_o) - f_o_ref)))
    assert np.allclose(np.asarray(out), out_ref, atol=5e-3, rtol=5e-3), \
        float(np.max(np.abs(np.asarray(out) - out_ref)))

    print("KERNEL_OK")
</pallas_src>

<mosaic_0001>
module attributes {stable_mosaic.version = 11 : i64} {
  func.func @population_kernel(%arg0: i32, %arg1: memref<64x32xf32, #tpu.memory_space<vmem>>, %arg2: memref<64x16xf32, #tpu.memory_space<vmem>>, %arg3: memref<32x128xbf16, #tpu.memory_space<vmem>>, %arg4: memref<16x128xbf16, #tpu.memory_space<vmem>>, %arg5: memref<1x128xf32, #tpu.memory_space<vmem>>, %arg6: memref<1x128xf32, #tpu.memory_space<vmem>>, %arg7: memref<256x128xbf16, #tpu.memory_space<vmem>>, %arg8: memref<1x128xf32, #tpu.memory_space<vmem>>, %arg9: memref<64x128xf32, #tpu.memory_space<vmem>>, %arg10: memref<64x256xf32, #tpu.memory_space<vmem>>) attributes {dimension_semantics = [#tpu.dimension_semantics<parallel>], iteration_bounds = array<i64: 1>, scalar_prefetch = 0 : i64, scratch_operands = 0 : i64, tpu.core_type = #tpu.core_type<tc>, window_params = [{transform_indices = @transform_0, window_bounds = array<i64: 64, 32>}, {transform_indices = @transform_1, window_bounds = array<i64: 64, 16>}, {pipeline_mode = #tpu.pipeline_mode<synchronous>, transform_indices = @transform_2, window_bounds = array<i64: 32, 128>}, {pipeline_mode = #tpu.pipeline_mode<synchronous>, transform_indices = @transform_3, window_bounds = array<i64: 16, 128>}, {pipeline_mode = #tpu.pipeline_mode<synchronous>, transform_indices = @transform_4, window_bounds = array<i64: 1, 128>}, {pipeline_mode = #tpu.pipeline_mode<synchronous>, transform_indices = @transform_5, window_bounds = array<i64: 1, 128>}, {pipeline_mode = #tpu.pipeline_mode<synchronous>, transform_indices = @transform_6, window_bounds = array<i64: 256, 128>}, {pipeline_mode = #tpu.pipeline_mode<synchronous>, transform_indices = @transform_7, window_bounds = array<i64: 1, 128>}, {transform_indices = @transform_8, window_bounds = array<i64: 64, 128>}, {transform_indices = @transform_9, window_bounds = array<i64: 64, 256>}]} {
    %c0 = arith.constant 0 : index
    %c0_0 = arith.constant 0 : index
    %0 = vector.load %arg1[%c0, %c0_0] : memref<64x32xf32, #tpu.memory_space<vmem>>, vector<64x32xf32>
    %1 = arith.truncf %0 : vector<64x32xf32> to vector<64x32xbf16>
    %c0_1 = arith.constant 0 : index
    %c0_2 = arith.constant 0 : index
    %2 = vector.load %arg3[%c0_1, %c0_2] : memref<32x128xbf16, #tpu.memory_space<vmem>>, vector<32x128xbf16>
    %cst = arith.constant dense<0.000000e+00> : vector<64x128xf32>
    %3 = tpu.matmul %1, %2, %cst {dimension_numbers = #tpu.dot_dimension_numbers<[1], [0], [0], [1], [0, 0, 1, 1], [], []>} : vector<64x32xbf16>, vector<32x128xbf16>, vector<64x128xf32> -> vector<64x128xf32>
    %c0_3 = arith.constant 0 : index
    %c0_4 = arith.constant 0 : index
    %4 = vector.load %arg5[%c0_3, %c0_4] : memref<1x128xf32, #tpu.memory_space<vmem>>, vector<1x128xf32>
    %5 = vector.broadcast %4 : vector<1x128xf32> to vector<64x128xf32>
    %6 = arith.addf %3, %5 : vector<64x128xf32>
    %c0_5 = arith.constant 0 : index
    %c0_6 = arith.constant 0 : index
    %7 = vector.load %arg2[%c0_5, %c0_6] : memref<64x16xf32, #tpu.memory_space<vmem>>, vector<64x16xf32>
    %8 = arith.truncf %7 : vector<64x16xf32> to vector<64x16xbf16>
    %c0_7 = arith.constant 0 : index
    %c0_8 = arith.constant 0 : index
    %9 = vector.load %arg4[%c0_7, %c0_8] : memref<16x128xbf16, #tpu.memory_space<vmem>>, vector<16x128xbf16>
    %cst_9 = arith.constant dense<0.000000e+00> : vector<64x128xf32>
    %10 = tpu.matmul %8, %9, %cst_9 {dimension_numbers = #tpu.dot_dimension_numbers<[1], [0], [0], [1], [0, 0, 1, 1], [], []>} : vector<64x16xbf16>, vector<16x128xbf16>, vector<64x128xf32> -> vector<64x128xf32>
    %c0_10 = arith.constant 0 : index
    %c0_11 = arith.constant 0 : index
    %11 = vector.load %arg6[%c0_10, %c0_11] : memref<1x128xf32, #tpu.memory_space<vmem>>, vector<1x128xf32>
    %12 = vector.broadcast %11 : vector<1x128xf32> to vector<64x128xf32>
    %13 = arith.addf %10, %12 : vector<64x128xf32>
    %c0_12 = arith.constant 0 : index
    %c0_13 = arith.constant 0 : index
    %14 = vector.load %arg10[%c0_12, %c0_13] : memref<64x256xf32, #tpu.memory_space<vmem>>, vector<64x128xf32>
    tpu.vector_store %arg10[%c0_12, %c0_13], %6 {strides = array<i32>} : memref<64x256xf32, #tpu.memory_space<vmem>>, vector<64x128xf32>,
    %c0_14 = arith.constant 0 : index
    %c128 = arith.constant 128 : index
    %15 = vector.load %arg10[%c0_14, %c128] : memref<64x256xf32, #tpu.memory_space<vmem>>, vector<64x128xf32>
    tpu.vector_store %arg10[%c0_14, %c128], %13 {strides = array<i32>} : memref<64x256xf32, #tpu.memory_space<vmem>>, vector<64x128xf32>,
    %16 = arith.truncf %6 : vector<64x128xf32> to vector<64x128xbf16>
    %c0_15 = arith.constant 0 : index
    %c0_16 = arith.constant 0 : index
    %17 = vector.load %arg7[%c0_15, %c0_16] : memref<256x128xbf16, #tpu.memory_space<vmem>>, vector<128x128xbf16>
    %cst_17 = arith.constant dense<0.000000e+00> : vector<64x128xf32>
    %18 = tpu.matmul %16, %17, %cst_17 {dimension_numbers = #tpu.dot_dimension_numbers<[1], [0], [0], [1], [0, 0, 1, 1], [], []>} : vector<64x128xbf16>, vector<128x128xbf16>, vector<64x128xf32> -> vector<64x128xf32>
    %19 = arith.truncf %13 : vector<64x128xf32> to vector<64x128xbf16>
    %c128_18 = arith.constant 128 : index
    %c0_19 = arith.constant 0 : index
    %20 = vector.load %arg7[%c128_18, %c0_19] : memref<256x128xbf16, #tpu.memory_space<vmem>>, vector<128x128xbf16>
    %cst_20 = arith.constant dense<0.000000e+00> : vector<64x128xf32>
    %21 = tpu.matmul %19, %20, %cst_20 {dimension_numbers = #tpu.dot_dimension_numbers<[1], [0], [0], [1], [0, 0, 1, 1], [], []>} : vector<64x128xbf16>, vector<128x128xbf16>, vector<64x128xf32> -> vector<64x128xf32>
    %22 = arith.addf %18, %21 : vector<64x128xf32>
    %c0_21 = arith.constant 0 : index
    %c0_22 = arith.constant 0 : index
    %23 = vector.load %arg8[%c0_21, %c0_22] : memref<1x128xf32, #tpu.memory_space<vmem>>, vector<1x128xf32>
    %24 = vector.broadcast %23 : vector<1x128xf32> to vector<64x128xf32>
    %25 = arith.addf %22, %24 : vector<64x128xf32>
    %c0_23 = arith.constant 0 : index
    %c0_24 = arith.constant 0 : index
    %26 = vector.load %arg9[%c0_23, %c0_24] : memref<64x128xf32, #tpu.memory_space<vmem>>, vector<64x128xf32>
    tpu.vector_store %arg9[%c0_23, %c0_24], %25 {strides = array<i32>} : memref<64x128xf32, #tpu.memory_space<vmem>>, vector<64x128xf32>,
    return
  }
  func.func @transform_0(%arg0: i32) -> (i32, i32) {
    %c0_i32 = arith.constant 0 : i32
    %c0_i32_0 = arith.constant 0 : i32
    return %arg0, %c0_i32 : i32, i32
  }
  func.func @transform_1(%arg0: i32) -> (i32, i32) {
    %c0_i32 = arith.constant 0 : i32
    %c0_i32_0 = arith.constant 0 : i32
    return %arg0, %c0_i32 : i32, i32
  }
  func.func @transform_2(%arg0: i32) -> (i32, i32) {
    %c0_i32 = arith.constant 0 : i32
    %c0_i32_0 = arith.constant 0 : i32
    %c0_i32_1 = arith.constant 0 : i32
    return %c0_i32, %c0_i32_0 : i32, i32
  }
  func.func @transform_3(%arg0: i32) -> (i32, i32) {
    %c0_i32 = arith.constant 0 : i32
    %c0_i32_0 = arith.constant 0 : i32
    %c0_i32_1 = arith.constant 0 : i32
    return %c0_i32, %c0_i32_0 : i32, i32
  }
  func.func @transform_4(%arg0: i32) -> (i32, i32) {
    %c0_i32 = arith.constant 0 : i32
    %c0_i32_0 = arith.constant 0 : i32
    %c0_i32_1 = arith.constant 0 : i32
    return %c0_i32, %c0_i32_0 : i32, i32
  }
  func.func @transform_5(%arg0: i32) -> (i32, i32) {
    %c0_i32 = arith.constant 0 : i32
    %c0_i32_0 = arith.constant 0 : i32
    %c0_i32_1 = arith.constant 0 : i32
    return %c0_i32, %c0_i32_0 : i32, i32
  }
  func.func @transform_6(%arg0: i32) -> (i32, i32) {
    %c0_i32 = arith.constant 0 : i32
    %c0_i32_0 = arith.constant 0 : i32
    %c0_i32_1 = arith.constant 0 : i32
    return %c0_i32, %c0_i32_0 : i32, i32
  }
  func.func @transform_7(%arg0: i32) -> (i32, i32) {
    %c0_i32 = arith.constant 0 : i32
    %c0_i32_0 = arith.constant 0 : i32
    %c0_i32_1 = arith.constant 0 : i32
    return %c0_i32, %c0_i32_0 : i32, i32
  }
  func.func @transform_8(%arg0: i32) -> (i32, i32) {
    %c0_i32 = arith.constant 0 : i32
    %c0_i32_0 = arith.constant 0 : i32
    return %arg0, %c0_i32 : i32, i32
  }
  func.func @transform_9(%arg0: i32) -> (i32, i32) {
    %c0_i32 = arith.constant 0 : i32
    %c0_i32_0 = arith.constant 0 : i32
    return %arg0, %c0_i32 : i32, i32
  }
}

</mosaic_0001>

<bundles_post_ra>
// kernel: tpu_custom_call.1
= control target key start
LH: loop header
LB: loop body
LE: loop exit
PB: predicated region body
PF: predicated region fallthrough
CT: control target
= control target key end

     0   :  { %15 = vsyncpa [#allocation3], 0  ;;  %vm174_vm0 = vcmask 130048   ;;  %vm69_vm1 = vcmask 261120   ;;  %s1007_s0 = inlined_call_operand.vmem [shape: f32[64,32], index: 0, kind: input, shape index: {}]   ;;  %s1008_s1 = inlined_call_operand.vmem [shape: f32[64,16], index: 1, kind: input, shape index: {}]   ;;  %s1009_s2 = inlined_call_operand.vmem [shape: bf16[32,128], index: 2, kind: input, shape index: {}]   ;;  %s1010_s3 = inlined_call_operand.vmem [shape: bf16[16,128], index: 3, kind: input, shape index: {}]   ;;  %s1011_s4 = inlined_call_operand.vmem [shape: f32[1,128], index: 4, kind: input, shape index: {}]   ;;  %s1012_s5 = inlined_call_operand.vmem [shape: f32[1,128], index: 5, kind: input, shape index: {}]   ;;  %s1013_s6 = inlined_call_operand.vmem [shape: bf16[256,128], index: 6, kind: input, shape index: {}]   ;;  %s1014_s7 = inlined_call_operand.vmem [shape: f32[1,128], index: 7, kind: input, shape index: {}]   ;;  %s1015_s8 = inlined_call_operand.hbm [shape: f32[64,128], index: 8, kind: output, shape index: {0}]   ;;  %s1016_s9 = inlined_call_operand.hbm [shape: f32[64,256], index: 9, kind: output, shape index: {1}]  }
   0x1   :  { %v738_v0 = vld [vmem:[%s1009_s2] sm:$0xff]   ;;  %v148_v3 = vld [vmem:[%s1008_s1 + $0x8] sm:$0xff]  ;;  %v149_v6 = vld [vmem:[%s1008_s1 + $0x10] sm:$0xff] }
   0x2   :  { %v739_v1 = vld [vmem:[%s1010_s3] sm:$0xff]   ;;  %654 = vmatprep.subr.bf16.mxu0 %v738_v0  ;;  %v740_v5 = vld [vmem:[%s1009_s2 + $0x8] sm:$0xff]   ;;  %v150_v7 = vld [vmem:[%s1008_s1 + $0x18] sm:$0xff] }
   0x3   :  { %v147_v2 = vld [vmem:[%s1008_s1] sm:$0xff]  ;;  %666 = vmatprep.subr.bf16.mxu1 %v739_v1  ;;  %655 = vmatpush3.bf16.msra.mxu0 %v738_v0  ;;  %v35_v9 = vld [vmem:[%s1007_s0 + $0x8] sm:$0xff]  ;;  %v156_v10 = vpack.c.bf16 %v150_v7, %v149_v6  ;;  %v36_v12 = vld [vmem:[%s1007_s0 + $0x10] sm:$0xff] }
   0x4   :  { %v155_v4 = vpack.c.bf16 %v148_v3, %v147_v2  ;;  %667 = vmatpush3.bf16.msra.mxu1 %v739_v1  ;;  %v34_v8 = vld [vmem:[%s1007_s0] sm:$0xff]  ;;  %656 = vmatprep.subr.bf16.mxu0 %v740_v5  ;;  %v37_v13 = vld [vmem:[%s1007_s0 + $0x18] sm:$0xff]  ;;  %v152_v16 = vld [vmem:[%s1008_s1 + $0x28] sm:$0xff] }
   0x5   :  { %v42_v11 = vpack.c.bf16 %v35_v9, %v34_v8  ;;  %v151_v14 = vld [vmem:[%s1008_s1 + $0x20] sm:$0xff]  ;;  %v43_v15 = vpack.c.bf16 %v37_v13, %v36_v12  ;;  %v153_v18 = vld [vmem:[%s1008_s1 + $0x30] sm:$0xff]  ;;  %v39_v20 = vld [vmem:[%s1007_s0 + $0x28] sm:$0xff] }
   0x6   :  { %668 = vmatprep.mubr.msk.bf16.mxu1 %vm174_vm0, %v155_v4  ;;  %v157_v17 = vpack.c.bf16 %v152_v16, %v151_v14  ;;  %v38_v19 = vld [vmem:[%s1007_s0 + $0x20] sm:$0xff]  ;;  %v154_v21 = vld [vmem:[%s1008_s1 + $0x38] sm:$0xff]  ;;  %v40_v23 = vld [vmem:[%s1007_s0 + $0x30] sm:$0xff] }
   0x7   :  { %669 = vmatmul.mubr.msk.bf16.vlgmr.msra.gmra.mrb[0].mxu1 %vm174_vm0, %v156_v10  ;;  %657 = vmatpush3.bf16.msra.mxu0 %v740_v5  ;;  %v44_v22 = vpack.c.bf16 %v39_v20, %v38_v19  ;;  %v41_v24 = vld [vmem:[%s1007_s0 + $0x38] sm:$0xff]  ;;  %v741_v25 = vld [vmem:[%s1013_s6 + $0x40] sm:$0xff]   ;;  %v742_v26 = vld [vmem:[%s1013_s6 + $0x48] sm:$0xff]   ;;  %v158_v27 = vpack.c.bf16 %v154_v21, %v153_v18 }
   0x8   :  { %658 = vmatprep.mubr.msk.bf16.mxu0 %vm69_vm1, %v42_v11  ;;  %672 = vmatprep.mubr.msk.bf16.mxu1 %vm174_vm0, %v157_v17  ;;  %v743_v28 = vld [vmem:[%s1013_s6] sm:$0xff]   ;;  %v744_v29 = vld [vmem:[%s1013_s6 + $0x50] sm:$0xff]   ;;  %v745_v30 = vld [vmem:[%s1013_s6 + $0x8] sm:$0xff]   ;;  %v45_v31 = vpack.c.bf16 %v41_v24, %v40_v23 }
   0x9   :  { %676 = vmatprep.subr.bf16.mxu0 %v741_v25  ;;  %700 = vmatprep.subr.bf16.mxu1 %v743_v28  ;;  %v747_v32 = vld [vmem:[%s1013_s6 + $0x10] sm:$0xff]   ;;  %v746_v33 = vld [vmem:[%s1013_s6 + $0x58] sm:$0xff]   ;;  %v748_v34 = vld [vmem:[%s1013_s6 + $0x60] sm:$0xff]  }
   0xa   :  { %659 = vmatmul.mubr.msk.bf16.vlgmr.msra.gmra.mrb[0].mxu0 %vm69_vm1, %v43_v15  ;;  %701 = vmatpush3.bf16.msra.mxu1 %v743_v28  ;;  %v749_v35 = vld [vmem:[%s1013_s6 + $0x18] sm:$0xff]  }
   0xb   :  { %662 = vmatprep.mubr.msk.bf16.mxu0 %vm69_vm1, %v44_v22  ;;  %677 = vmatpush3.bf16.msra.mxu0 %v741_v25 }
   0xc   :  { %678 = vmatprep.subr.bf16.mxu0 %v742_v26  ;;  %702 = vmatprep.subr.bf16.mxu1 %v745_v30 }
   0xe   :  { %703 = vmatpush3.bf16.msra.mxu1 %v745_v30 }
   0xf   :  { %673 = vmatmul.mubr.msk.bf16.gmra.mrb[4].mxu1 %vm174_vm0, %v158_v27  ;;  %679 = vmatpush3.bf16.msra.mxu0 %v742_v26 }
  0x10   :  { %680 = vmatprep.subr.bf16.mxu0 %v744_v29  ;;  %704 = vmatprep.subr.bf16.mxu1 %v747_v32 }
  0x12   :  { %663 = vmatmul.mubr.msk.bf16.gmra.mrb[4].mxu0 %vm69_vm1, %v45_v31  ;;  %705 = vmatpush3.bf16.msra.mxu1 %v747_v32 }
  0x13   :  { %681 = vmatpush3.bf16.msra.mxu0 %v744_v29 }
  0x14   :  { %682 = vmatprep.subr.bf16.mxu0 %v746_v33 }
  0x15   :  { %16 = vsyncpa [#allocation5], 0  ;;  %706 = vmatprep.subr.bf16.mxu1 %v749_v35  ;;  %v751_v36 = vld [vmem:[%s1013_s6 + $0x20] sm:$0xff]   ;;  %v750_v37 = vld [vmem:[%s1013_s6 + $0x68] sm:$0xff]  }
  0x16   :  { %707 = vmatpush3.bf16.msra.mxu1 %v749_v35  ;;  %v752_v38 = vld [vmem:[%s1013_s6 + $0x70] sm:$0xff]   ;;  %v753_v39 = vld [vmem:[%s1013_s6 + $0x28] sm:$0xff]   ;;  %v754_v40 = vld [vmem:[%s1013_s6 + $0x78] sm:$0xff]  }
  0x17   :  { %683 = vmatpush3.bf16.msra.mxu0 %v746_v33  ;;  %708 = vmatprep.subr.bf16.mxu1 %v751_v36  ;;  %v755_v41 = vld [vmem:[%s1013_s6 + $0x30] sm:$0xff]   ;;  %v756_v42 = vld [vmem:[%s1013_s6 + $0x38] sm:$0xff]   ;;  %v596_v43 = vld [vmem:[%s1012_s5] ss:$0 sm:$0xff] }
  0x18   :  { %684 = vmatprep.subr.bf16.mxu0 %v748_v34  ;;  %v589_v47 = vld [vmem:[%s1011_s4] ss:$0 sm:$0xff]  ;;  %s805_s4 = smov [#allocation4]  }
  0x19   :  { %s574_s5 = sshll.u32 %s805_s4, 4  ;;  %s575_s5 = int_to_ptr.vmem [resolvable:$true] %s574_s5 }
  0x1a   :  { %709 = vmatpush3.bf16.msra.mxu1 %v751_v36  ;;  %s757_s6 = scalar_lea.vmem %s575_s5, 2048  ;;  %p762_p1 = scmp.lt.s32.totalorder %s575_s5, %s575_s5 }
  0x1b   :  { %685 = vmatpush3.bf16.msra.mxu0 %v748_v34  ;;  %710 = vmatprep.subr.bf16.mxu1 %v753_v39  ;;  %p758_p0 = scmp.ne.s32.totalorder %s575_s5, %s757_s6  ;;  %p763_p2 = scmp.lt.s32.totalorder %s757_s6, %s757_s6 }
  0x1c   :  { %686 = vmatprep.subr.bf16.mxu0 %v750_v37 }
  0x1d   :  { %p764_p3 = por %p763_p2, %p762_p1 }
  0x1e   :  { %711 = vmatpush3.bf16.msra.mxu1 %v753_v39 }
  0x1f   :  { %687 = vmatpush3.bf16.msra.mxu0 %v750_v37  ;;  %712 = vmatprep.subr.bf16.mxu1 %v755_v41  ;;  %p765_p4 = pnand %p764_p3, %p758_p0 }
  0x20   :  { %688 = vmatprep.subr.bf16.mxu0 %v752_v38 }
  0x22   :  { %713 = vmatpush3.bf16.msra.mxu1 %v755_v41 }
  0x23   :  { %689 = vmatpush3.bf16.msra.mxu0 %v752_v38  ;;  %714 = vmatprep.subr.bf16.mxu1 %v756_v42 }
  0x24   :  { %690 = vmatprep.subr.bf16.mxu0 %v754_v40 }
  0x26   :  { %715 = vmatpush3.bf16.msra.mxu1 %v756_v42 }
  0x27   :  { %691 = vmatpush3.bf16.msra.mxu0 %v754_v40 }
  0xda   :  { %v670_v44 = vpop.f32.mrb[0].mxu1 }
  0xdb   :  { %v230_v45 = vadd.f32 %v670_v44, %v596_v43  ;;  %v221_v46 = vpop.f32.mrb[1].mxu1 }
  0xdc   :  { %v222_v48 = vadd.f32 %v596_v43, %v221_v46  ;;  %v671_v49 = vpop.f32.mrb[2].mxu1 }
  0xdd   :  { %262 = vst [vmem:[#allocation4 + $0x28] sm:$0xff] %v230_v45  ;;  %v233_v50 = vadd.f32 %v671_v49, %v596_v43  ;;  %v224_v51 = vpop.f32.mrb[3].mxu1  ;;  %v660_v52 = vpop.f32.mrb[0].mxu0 }
  0xde   :  { %260 = vst [vmem:[#allocation4 + $0x8] sm:$0xff] %v222_v48  ;;  %v225_v53 = vadd.f32 %v596_v43, %v224_v51  ;;  %v125_v54 = vadd.f32 %v660_v52, %v589_v47  ;;  %v116_v55 = vpop.f32.mrb[1].mxu0 }
  0xdf   :  { %263 = vst [vmem:[#allocation4 + $0x38] sm:$0xff] %v233_v50  ;;  %v289_v56 = vpack.c.bf16 %v233_v50, %v230_v45  ;;  %v117_v57 = vadd.f32 %v589_v47, %v116_v55  ;;  %v661_v58 = vpop.f32.mrb[2].mxu0 }
  0xe0   :  { %261 = vst [vmem:[#allocation4 + $0x18] sm:$0xff] %v225_v53  ;;  %v288_v59 = vpack.c.bf16 %v225_v53, %v222_v48  ;;  %254 = vst [vmem:[#allocation4 + $0x20] sm:$0xff] %v125_v54  ;;  %v128_v60 = vadd.f32 %v661_v58, %v589_v47  ;;  %v119_v61 = vpop.f32.mrb[3].mxu0 }
  0xe1   :  { %252 = vst [vmem:[#allocation4] sm:$0xff] %v117_v57  ;;  %v120_v62 = vadd.f32 %v589_v47, %v119_v61 }
  0xe2   :  { %255 = vst [vmem:[#allocation4 + $0x30] sm:$0xff] %v128_v60  ;;  %v269_v63 = vpack.c.bf16 %v128_v60, %v125_v54  ;;  %v674_v0 = vpop.f32.mrb[4].mxu1  ;;  %692 = vmatprep.mubr.bf16.mxu0 %v288_v59 }
  0xe3   :  { %253 = vst [vmem:[#allocation4 + $0x10] sm:$0xff] %v120_v62  ;;  %v268_v1 = vpack.c.bf16 %v120_v62, %v117_v57  ;;  %v246_v2 = vadd.f32 %v674_v0, %v596_v43  ;;  %v237_v3 = vpop.f32.mrb[5].mxu1  ;;  %693 = vmatmul.mubr.bf16.vlgmr.msra.gmra.mrb[8].mxu0 %v289_v56 }
  0xe4   :  { %v238_v4 = vadd.f32 %v596_v43, %v237_v3  ;;  %v675_v5 = vpop.f32.mrb[6].mxu1 }
  0xe5   :  { %266 = vst [vmem:[#allocation4 + $0x68] sm:$0xff] %v246_v2  ;;  %v249_v6 = vadd.f32 %v675_v5, %v596_v43  ;;  %v240_v7 = vpop.f32.mrb[7].mxu1  ;;  %v664_v8 = vpop.f32.mrb[4].mxu0  ;;  %716 = vmatprep.mubr.bf16.mxu1 %v268_v1 }
  0xe6   :  { %264 = vst [vmem:[#allocation4 + $0x48] sm:$0xff] %v238_v4  ;;  %v241_v9 = vadd.f32 %v596_v43, %v240_v7  ;;  %v141_v10 = vadd.f32 %v664_v8, %v589_v47  ;;  %v132_v11 = vpop.f32.mrb[5].mxu0  ;;  %717 = vmatmul.mubr.bf16.vlgmr.msra.gmra.mrb[8].mxu1 %v269_v63 }
  0xe7   :  { %267 = vst [vmem:[#allocation4 + $0x78] sm:$0xff] %v249_v6  ;;  %v291_v12 = vpack.c.bf16 %v249_v6, %v246_v2  ;;  %v133_v13 = vadd.f32 %v589_v47, %v132_v11  ;;  %v665_v14 = vpop.f32.mrb[6].mxu0 }
  0xe8   :  { %265 = vst [vmem:[#allocation4 + $0x58] sm:$0xff] %v241_v9  ;;  %v290_v15 = vpack.c.bf16 %v241_v9, %v238_v4  ;;  %258 = vst [vmem:[#allocation4 + $0x60] sm:$0xff] %v141_v10  ;;  %v144_v16 = vadd.f32 %v665_v14, %v589_v47  ;;  %v135_v17 = vpop.f32.mrb[7].mxu0 }
  0xe9   :  { %256 = vst [vmem:[#allocation4 + $0x40] sm:$0xff] %v133_v13  ;;  %v136_v18 = vadd.f32 %v589_v47, %v135_v17 }
  0xea   :  { %259 = vst [vmem:[#allocation4 + $0x70] sm:$0xff] %v144_v16  ;;  %v271_v19 = vpack.c.bf16 %v144_v16, %v141_v10  ;;  %696 = vmatprep.mubr.bf16.mxu0 %v290_v15 }
  0xeb   :  { %257 = vst [vmem:[#allocation4 + $0x50] sm:$0xff] %v136_v18  ;;  %v270_v20 = vpack.c.bf16 %v136_v18, %v133_v13  ;;  %697 = vmatmul.mubr.bf16.gmra.mrb[12].mxu0 %v291_v12 }
  0xed   :  { %720 = vmatprep.mubr.bf16.mxu1 %v270_v20 }
  0xee   :  { %721 = vmatmul.mubr.bf16.gmra.mrb[12].mxu1 %v271_v19 }
  0xef   :  { %768 = shalt.err (!%p765_p4)
}
  0xf0   :  { %s769_s12 = scalar_lea.hbm %s1016_s9, 2048 }
  0xf1   :  { %p770_p5 = scmp.ne.s32.totalorder %s1016_s9, %s769_s12  ;;  %p773_p6 = scmp.lt.u32.totalorder %s769_s12, %s1016_s9 }
  0xf3   :  { %p775_p7 = pnand %p773_p6, %p770_p5 }
  0xf5   :  { %778 = shalt.err (!%p775_p7)
}
  0xf6   :  { %s806_s17 = smov 256   ;;  %s807_s18 = smov 16   ;;  %v618_v26 = vld [vmem:[%s1014_s7] ss:$0 sm:$0xff] }
  0xf7   :  { %580 = dma.vmem_to_hbm [thread:$0]  %s575_s5, 2048, %s1016_s9, [#allocation5], %s806_s17, %s806_s17, %s807_s18  }
  0xf8   :  { %s808_s7 = smov [#allocation2]  }
  0xf9   :  { %s562_s9 = sshll.u32 %s808_s7, 4  ;;  %s563_s9 = int_to_ptr.vmem [resolvable:$true] %s562_s9 }
  0xfa   :  { %s779_s22 = scalar_lea.vmem %s563_s9, 1024  ;;  %p784_p9 = scmp.lt.s32.totalorder %s563_s9, %s563_s9 }
  0xfb   :  { %p780_p8 = scmp.ne.s32.totalorder %s563_s9, %s779_s22  ;;  %p785_p10 = scmp.lt.s32.totalorder %s779_s22, %s779_s22 }
  0xfd   :  { %p786_p11 = por %p785_p10, %p784_p9 }
  0xff   :  { %p787_p12 = pnand %p786_p11, %p780_p8 }
 0x1b6   :  { %v694_v21 = vpop.f32.mrb[8].mxu0 }
 0x1b7   :  { %v390_v22 = vpop.f32.mrb[9].mxu0 }
 0x1b8   :  { %v695_v23 = vpop.f32.mrb[10].mxu0 }
 0x1b9   :  { %v393_v24 = vpop.f32.mrb[11].mxu0  ;;  %v718_v25 = vpop.f32.mrb[8].mxu1 }
 0x1ba   :  { %v512_v27 = vadd.f32 %v718_v25, %v694_v21  ;;  %v503_v28 = vpop.f32.mrb[9].mxu1 }
 0x1bb   :  { %v504_v29 = vadd.f32 %v503_v28, %v390_v22  ;;  %v719_v30 = vpop.f32.mrb[10].mxu1 }
 0x1bc   :  { %v543_v31 = vadd.f32 %v618_v26, %v512_v27  ;;  %v515_v32 = vadd.f32 %v719_v30, %v695_v23  ;;  %v506_v33 = vpop.f32.mrb[11].mxu1 }
 0x1bd   :  { %v541_v34 = vadd.f32 %v618_v26, %v504_v29  ;;  %v507_v35 = vadd.f32 %v506_v33, %v393_v24 }
 0x1be   :  { %551 = vst [vmem:[#allocation2 + $0x10] sm:$0xff] %v543_v31  ;;  %v544_v36 = vadd.f32 %v618_v26, %v515_v32  ;;  %v698_v37 = vpop.f32.mrb[12].mxu0 }
 0x1bf   :  { %549 = vst [vmem:[#allocation2] sm:$0xff] %v541_v34  ;;  %v542_v38 = vadd.f32 %v618_v26, %v507_v35  ;;  %v406_v39 = vpop.f32.mrb[13].mxu0 }
 0x1c0   :  { %552 = vst [vmem:[#allocation2 + $0x18] sm:$0xff] %v544_v36  ;;  %v699_v40 = vpop.f32.mrb[14].mxu0 }
 0x1c1   :  { %550 = vst [vmem:[#allocation2 + $0x8] sm:$0xff] %v542_v38  ;;  %v409_v41 = vpop.f32.mrb[15].mxu0  ;;  %v722_v42 = vpop.f32.mrb[12].mxu1 }
 0x1c2   :  { %v528_v43 = vadd.f32 %v722_v42, %v698_v37  ;;  %v519_v44 = vpop.f32.mrb[13].mxu1 }
 0x1c3   :  { %v520_v45 = vadd.f32 %v519_v44, %v406_v39  ;;  %v723_v46 = vpop.f32.mrb[14].mxu1 }
 0x1c4   :  { %v547_v47 = vadd.f32 %v618_v26, %v528_v43  ;;  %v531_v48 = vadd.f32 %v723_v46, %v699_v40  ;;  %v522_v49 = vpop.f32.mrb[15].mxu1 }
 0x1c5   :  { %v545_v50 = vadd.f32 %v618_v26, %v520_v45  ;;  %v523_v51 = vadd.f32 %v522_v49, %v409_v41 }
 0x1c6   :  { %555 = vst [vmem:[#allocation2 + $0x30] sm:$0xff] %v547_v47  ;;  %v548_v52 = vadd.f32 %v618_v26, %v531_v48 }
 0x1c7   :  { %553 = vst [vmem:[#allocation2 + $0x20] sm:$0xff] %v545_v50  ;;  %v546_v53 = vadd.f32 %v618_v26, %v523_v51 }
 0x1c8   :  { %556 = vst [vmem:[#allocation2 + $0x38] sm:$0xff] %v548_v52 }
 0x1c9   :  { %554 = vst [vmem:[#allocation2 + $0x28] sm:$0xff] %v546_v53 }
 0x1ca   :  { %790 = shalt.err (!%p787_p12)
}
 0x1cb   :  { %s791_s25 = scalar_lea.hbm %s1015_s8, 1024 }
 0x1cc   :  { %p792_p13 = scmp.ne.s32.totalorder %s1015_s8, %s791_s25  ;;  %p795_p0 = scmp.lt.u32.totalorder %s791_s25, %s1015_s8 }
 0x1ce   :  { %p797_p1 = pnand %p795_p0, %p792_p13 }
 0x1d0   :  { %800 = shalt.err (!%p797_p1)
}
 0x1d1   :  { %s809_s27 = smov 128   ;;  %s810_s28 = smov 8  }
 0x1d2   :  { %568 = dma.vmem_to_hbm [thread:$0]  %s563_s9, 1024, %s1015_s8, [#allocation3], %s809_s27, %s809_s27, %s810_s28  }
 0x1d3   :  { %801 = dma.done.wait [#allocation3], 1024  }
 0x1d4   :  { %802 = vsyncadd [#allocation3], 4294966272 }
 0x1d5   :  { %803 = dma.done.wait [#allocation5], 2048  }
 0x1d6   :  { %804 = vsyncadd [#allocation5], 4294965248 }
 0x1d7   :  { %587 = vsyncpa [#allocation3], 1 }
 0x1d8   :  { %588 = vsyncpa [#allocation5], 1 }

</bundles_post_ra>
